<compile_context>
chip_gen: v6e
topology: v6e:2x2x1
jax: 0.10.0
libtpu: 0.0.40
codegen_flags: <defaults>
</compile_context>

<pallas_src>
import jax
import jax.numpy as jnp
from jax.experimental import pallas as pl
from jax.experimental.pallas import tpu as pltpu

# small, module-consistent shapes
B, S, H, P, E, VOCAB = 2, 8, 32, 16, 4, 50
LANE = 128


def _round_up(x, m):
    return ((x + m - 1) // m) * m


def _project_normalize(hidden_ref, w_ref, b_ref):
    """x @ W + b followed by L2 normalization along the last dim (all f32)."""
    proj = jnp.dot(hidden_ref[...], w_ref[...],
                   preferred_element_type=jnp.float32) + b_ref[...]   # (BS, P)
    sumsq = jnp.sum(proj * proj, axis=-1, keepdims=True)
    # F.normalize(p=2, dim=-1, eps=1e-12): x / max(||x||, 1e-12)
    #   == x * rsqrt(max(||x||^2, 1e-24)); rsqrt runs on the otherwise idle EUP.
    return proj * jax.lax.rsqrt(jnp.maximum(sumsq, 1e-24))


def _lane_pad(x, width):
    """Zero-pad the last dim to `width` so the store is lane-dense (unmasked vst)."""
    pad = width - x.shape[-1]
    if pad <= 0:
        return x
    return jnp.concatenate(
        [x, jnp.zeros((x.shape[0], pad), dtype=x.dtype)], axis=-1)


def nerfit_loss_kernel(hidden_ref, w_ref, b_ref, emb_ref, labels_ref, valid_ref,
                       normed_ref, loss_ref):
    # hidden_ref: (B*S, H)   w_ref: (H, P)   b_ref: (1, P)
    # emb_ref:    (B*E, P)   labels_ref / valid_ref: (B*E, B*S)
    # normed_ref: (B*S, P_pad)   loss_ref: (8, 128)
    normed = _project_normalize(hidden_ref, w_ref, b_ref)             # (B*S, P)
    normed_ref[...] = _lane_pad(normed, normed_ref.shape[-1])

    # torch.bmm(embeddings, normed.transpose(1, 2)) for all batches at once:
    # a single (B*E, P) x (B*S, P)^T MXU pass.  Cross-batch products are
    # discarded through the block-diagonal `valid` mask built in the wrapper.
    logits = jax.lax.dot_general(
        emb_ref[...], normed, (((1,), (1,)), ((), ())),
        preferred_element_type=jnp.float32)                           # (B*E, B*S)

    labels = labels_ref[...]
    valid = valid_ref[...]
    mask = (labels != -100.0).astype(jnp.float32) * valid
    lm = logits * mask
    ym = labels * mask
    # numerically-stable BCE-with-logits: max(x,0) - x*y + log1p(exp(-|x|)).
    # Label==-100 positions contribute log(2), exactly like the PyTorch module;
    # cross-batch (valid == 0) positions contribute nothing.
    bce = (jnp.maximum(lm, 0.0) - lm * ym
           + jnp.log1p(jnp.exp(-jnp.abs(lm)))) * valid

    loss_sum = jnp.sum(bce, keepdims=True)                            # (1, 1)
    cnt = jnp.sum(mask, keepdims=True)                                # (1, 1)
    # matches the module: sum-reduction BCE divided by mask.sum()
    # (NaN if every label is ignored — same behavior as the PyTorch code).
    loss = loss_sum / cnt
    # broadcast the scalar into one full (8,128) tile: single unmasked store.
    loss_ref[...] = jnp.zeros(loss_ref.shape, jnp.float32) + loss


def nerfit_project_kernel(hidden_ref, w_ref, b_ref, normed_ref):
    # loss-less path (labels / embeddings absent, or embeddings.size(1) == 0)
    normed = _project_normalize(hidden_ref, w_ref, b_ref)
    normed_ref[...] = _lane_pad(normed, normed_ref.shape[-1])


def nerfit_forward(hidden, w_t, bias, embeddings=None, labels=None):
    """hidden: (B,S,H) f32 (stand-in for base_model(...).last_hidden_state),
    w_t: (H,P) f32 projection weight (pre-transposed), bias: (1,P) f32,
    embeddings: (B,E,P) f32, labels: (B,E,S) f32 with -100 = ignore."""
    Bn, Sn, Hn = hidden.shape
    Pn = w_t.shape[1]
    BSn = Bn * Sn
    P_pad = _round_up(Pn, LANE)

    hidden2d = hidden.reshape(BSn, Hn)                 # batch the projection matmul
    vmem = pl.BlockSpec(memory_space=pltpu.MemorySpace.VMEM)

    has_loss = (labels is not None) and (embeddings is not None)
    En = embeddings.shape[1] if embeddings is not None else 0

    if has_loss and En > 0:
        BEn = Bn * En
        emb2d = embeddings.reshape(BEn, Pn)
        # Block-diagonal layout so the per-batch bmm becomes one masked 2-D dot:
        #   labels_big[b*E+e, b'*S+s] = labels[b,e,s] if b == b' else -100
        eye = jnp.eye(Bn, dtype=jnp.float32)
        valid4 = jnp.broadcast_to(eye[:, None, :, None], (Bn, En, Bn, Sn))
        labels_big = jnp.where(valid4 > 0, labels[:, :, None, :],
                               jnp.float32(-100.0)).reshape(BEn, Bn * Sn)
        valid_big = valid4.reshape(BEn, Bn * Sn).astype(jnp.float32)

        flops = int(2 * BSn * Hn * Pn + 2 * BEn * Pn * BSn + 12 * BEn * BSn)
        transcendentals = int(2 * BEn * BSn + BSn)
        bytes_accessed = int(4 * (hidden2d.size + w_t.size + bias.size
                                  + emb2d.size + 2 * labels_big.size
                                  + BSn * P_pad + 8 * LANE))

        normed_pad, loss_tile = pl.pallas_call(
            nerfit_loss_kernel,
            out_shape=(
                jax.ShapeDtypeStruct((BSn, P_pad), jnp.float32),   # lane-padded normed
                jax.ShapeDtypeStruct((8, LANE), jnp.float32),      # broadcast loss tile
            ),
            in_specs=[vmem] * 6,
            out_specs=(vmem, vmem),
            cost_estimate=pl.CostEstimate(
                flops=flops, transcendentals=transcendentals,
                bytes_accessed=bytes_accessed),
        )(hidden2d, w_t, bias, emb2d, labels_big, valid_big)

        normed = normed_pad[:, :Pn].reshape(Bn, Sn, Pn)
        loss = loss_tile[0, 0]
        return {"loss": loss, "logits": normed}

    # no-loss branches of the module
    normed_pad = pl.pallas_call(
        nerfit_project_kernel,
        out_shape=jax.ShapeDtypeStruct((BSn, P_pad), jnp.float32),
        in_specs=[vmem] * 3,
        out_specs=vmem,
    )(hidden2d, w_t, bias)
    normed = normed_pad[:, :Pn].reshape(Bn, Sn, Pn)
    loss = jnp.float32(0.0) if has_loss else None      # E == 0 -> 0.0, no labels -> None
    return {"loss": loss, "logits": normed}


def reference_forward(hidden, w_t, bias, embeddings, labels):
    """Pure-JAX replica of the PyTorch module semantics (for self-test)."""
    proj = jnp.einsum("bsh,hp->bsp", hidden, w_t) + bias[None]
    l2 = jnp.sqrt(jnp.sum(proj * proj, axis=-1, keepdims=True))
    normed = proj / jnp.maximum(l2, 1e-12)
    logits = jnp.einsum("bep,bsp->bes", embeddings, normed)
    mask = (labels != -100.0).astype(jnp.float32)
    lm = logits * mask
    ym = labels * mask
    bce = jnp.maximum(lm, 0.0) - lm * ym + jnp.log1p(jnp.exp(-jnp.abs(lm)))
    loss = jnp.sum(bce) / jnp.sum(mask)
    return loss, normed


if __name__ == "__main__":
    key = jax.random.PRNGKey(0)
    k_emb, k_ids, k_w, k_b, k_ent, k_lab, k_ign = jax.random.split(key, 7)

    # synthetic inputs (the module's forward signature: input_ids, attention_mask,
    # labels, embeddings)
    input_ids = jax.random.randint(k_ids, (B, S), 0, VOCAB, dtype=jnp.int32)
    attention_mask = jnp.ones((B, S), dtype=jnp.int32)

    # TODO(synk): the pretrained HF transformer (`AutoModel.from_pretrained`, plus
    # the optional PEFT/LoRA wrapper) has no in-script equivalent; a deterministic
    # embedding lookup (scaled by the attention mask) stands in for
    # `outputs.last_hidden_state`.
    emb_table = jax.random.normal(k_emb, (VOCAB, H), dtype=jnp.float32) * 0.1
    hidden = emb_table[input_ids] * attention_mask[..., None].astype(jnp.float32)

    # projection_layer = nn.Linear(H, P); weight stored pre-transposed as (H, P)
    w_t = jax.random.normal(k_w, (H, P), dtype=jnp.float32) * (1.0 / jnp.sqrt(H))
    bias = jax.random.normal(k_b, (1, P), dtype=jnp.float32) * 0.01

    # entity embeddings (B, E, P) and labels (B, E, S) in {0,1} with some -100
    embeddings = jax.random.normal(k_ent, (B, E, P), dtype=jnp.float32)
    embeddings = embeddings / jnp.linalg.norm(embeddings, axis=-1, keepdims=True)
    labels = jax.random.bernoulli(k_lab, 0.3, (B, E, S)).astype(jnp.float32)
    ignore = jax.random.bernoulli(k_ign, 0.2, (B, E, S))
    labels = jnp.where(ignore, jnp.float32(-100.0), labels)

    out = nerfit_forward(hidden, w_t, bias, embeddings, labels)
    jax.block_until_ready(out["loss"])
    jax.block_until_ready(out["logits"])

    ref_loss, ref_normed = reference_forward(hidden, w_t, bias, embeddings, labels)
    assert jnp.allclose(out["logits"], ref_normed, atol=1e-5, rtol=1e-5)
    assert jnp.allclose(out["loss"], ref_loss, atol=1e-5, rtol=1e-5)

    print("KERNEL_OK")
</pallas_src>

<mosaic_0001>
module attributes {stable_mosaic.version = 11 : i64} {
  func.func @nerfit_loss_kernel(%arg0: memref<16x32xf32, #tpu.memory_space<vmem>>, %arg1: memref<32x16xf32, #tpu.memory_space<vmem>>, %arg2: memref<1x16xf32, #tpu.memory_space<vmem>>, %arg3: memref<8x16xf32, #tpu.memory_space<vmem>>, %arg4: memref<8x16xf32, #tpu.memory_space<vmem>>, %arg5: memref<8x16xf32, #tpu.memory_space<vmem>>, %arg6: memref<16x128xf32, #tpu.memory_space<vmem>>, %arg7: memref<8x128xf32, #tpu.memory_space<vmem>>) attributes {dimension_semantics = [], scalar_prefetch = 0 : i64, scratch_operands = 0 : i64, tpu.core_type = #tpu.core_type<tc>} {
    %c0 = arith.constant 0 : index
    %c0_0 = arith.constant 0 : index
    %0 = vector.load %arg0[%c0, %c0_0] : memref<16x32xf32, #tpu.memory_space<vmem>>, vector<16x32xf32>
    %c0_1 = arith.constant 0 : index
    %c0_2 = arith.constant 0 : index
    %1 = vector.load %arg1[%c0_1, %c0_2] : memref<32x16xf32, #tpu.memory_space<vmem>>, vector<32x16xf32>
    %cst = arith.constant dense<0.000000e+00> : vector<16x16xf32>
    %2 = tpu.matmul %0, %1, %cst {dimension_numbers = #tpu.dot_dimension_numbers<[1], [0], [0], [1], [0, 0, 1, 1], [], []>} : vector<16x32xf32>, vector<32x16xf32>, vector<16x16xf32> -> vector<16x16xf32>
    %c0_3 = arith.constant 0 : index
    %c0_4 = arith.constant 0 : index
    %3 = vector.load %arg2[%c0_3, %c0_4] : memref<1x16xf32, #tpu.memory_space<vmem>>, vector<1x16xf32>
    %4 = vector.broadcast %3 : vector<1x16xf32> to vector<16x16xf32>
    %5 = arith.addf %2, %4 : vector<16x16xf32>
    %6 = arith.mulf %5, %5 : vector<16x16xf32>
    %cst_5 = arith.constant dense<0.000000e+00> : vector<16xf32>
    %7 = vector.multi_reduction <add>, %6, %cst_5 [1] : vector<16x16xf32> to vector<16xf32>
    %8 = vector.shape_cast %7 : vector<16xf32> to vector<16x1xf32>
    %cst_6 = arith.constant 1.000000e-24 : f32
    %9 = vector.broadcast %cst_6 : f32 to vector<16x1xf32>
    %10 = arith.maximumf %8, %9 : vector<16x1xf32>
    %11 = math.rsqrt %10 : vector<16x1xf32>
    %12 = vector.broadcast %11 : vector<16x1xf32> to vector<16x16xf32>
    %13 = arith.mulf %5, %12 : vector<16x16xf32>
    %cst_7 = arith.constant 0.000000e+00 : f32
    %14 = vector.broadcast %cst_7 : f32 to vector<16x112xf32>
    %15 = tpu.concatenate %13, %14 in 1 : vector<16x16xf32>, vector<16x112xf32> -> vector<16x128xf32>
    %c0_8 = arith.constant 0 : index
    %c0_9 = arith.constant 0 : index
    %16 = vector.load %arg6[%c0_8, %c0_9] : memref<16x128xf32, #tpu.memory_space<vmem>>, vector<16x128xf32>
    tpu.vector_store %arg6[%c0_8, %c0_9], %15 {strides = array<i32>} : memref<16x128xf32, #tpu.memory_space<vmem>>, vector<16x128xf32>,
    %c0_10 = arith.constant 0 : index
    %c0_11 = arith.constant 0 : index
    %17 = vector.load %arg3[%c0_10, %c0_11] : memref<8x16xf32, #tpu.memory_space<vmem>>, vector<8x16xf32>
    %cst_12 = arith.constant dense<0.000000e+00> : vector<8x16xf32>
    %18 = tpu.matmul %17, %13, %cst_12 {dimension_numbers = #tpu.dot_dimension_numbers<[1], [1], [0], [0], [0, 0, 1, 0], [], []>} : vector<8x16xf32>, vector<16x16xf32>, vector<8x16xf32> -> vector<8x16xf32>
    %c0_13 = arith.constant 0 : index
    %c0_14 = arith.constant 0 : index
    %19 = vector.load %arg4[%c0_13, %c0_14] : memref<8x16xf32, #tpu.memory_space<vmem>>, vector<8x16xf32>
    %c0_15 = arith.constant 0 : index
    %c0_16 = arith.constant 0 : index
    %20 = vector.load %arg5[%c0_15, %c0_16] : memref<8x16xf32, #tpu.memory_space<vmem>>, vector<8x16xf32>
    %cst_17 = arith.constant -1.000000e+02 : f32
    %21 = vector.broadcast %cst_17 : f32 to vector<8x16xf32>
    %22 = arith.cmpf one, %19, %21 : vector<8x16xf32>
    %23 = arith.extui %22 : vector<8x16xi1> to vector<8x16xi32>
    %24 = arith.sitofp %23 : vector<8x16xi32> to vector<8x16xf32>
    %25 = arith.mulf %24, %20 : vector<8x16xf32>
    %26 = arith.mulf %18, %25 : vector<8x16xf32>
    %27 = arith.mulf %19, %25 : vector<8x16xf32>
    %cst_18 = arith.constant 0.000000e+00 : f32
    %28 = vector.broadcast %cst_18 : f32 to vector<8x16xf32>
    %29 = arith.maximumf %26, %28 : vector<8x16xf32>
    %30 = arith.mulf %26, %27 : vector<8x16xf32>
    %31 = arith.subf %29, %30 : vector<8x16xf32>
    %32 = math.absf %26 : vector<8x16xf32>
    %cst_19 = arith.constant 0.000000e+00 : f32
    %33 = vector.broadcast %cst_19 : f32 to vector<8x16xf32>
    %34 = arith.subf %33, %32 : vector<8x16xf32>
    %35 = math.exp %34 : vector<8x16xf32>
    %36 = math.log1p %35 : vector<8x16xf32>
    %37 = arith.addf %31, %36 : vector<8x16xf32>
    %38 = arith.mulf %37, %20 : vector<8x16xf32>
    %39 = vector.shape_cast %38 : vector<8x16xf32> to vector<1x8x16xf32>
    %cst_20 = arith.constant dense<0.000000e+00> : vector<1xf32>
    %40 = vector.multi_reduction <add>, %39, %cst_20 [1, 2] : vector<1x8x16xf32> to vector<1xf32>
    %41 = vector.shape_cast %40 : vector<1xf32> to vector<1x1x1xf32>
    %42 = vector.extract %41[0, 0, 0] : f32 from vector<1x1x1xf32>
    %43 = vector.broadcast %42 : f32 to vector<1x1xf32>
    %44 = vector.shape_cast %25 : vector<8x16xf32> to vector<1x8x16xf32>
    %cst_21 = arith.constant dense<0.000000e+00> : vector<1xf32>
    %45 = vector.multi_reduction <add>, %44, %cst_21 [1, 2] : vector<1x8x16xf32> to vector<1xf32>
    %46 = vector.shape_cast %45 : vector<1xf32> to vector<1x1x1xf32>
    %47 = vector.extract %46[0, 0, 0] : f32 from vector<1x1x1xf32>
    %48 = vector.broadcast %47 : f32 to vector<1x1xf32>
    %49 = arith.divf %43, %48 : vector<1x1xf32>
    %cst_22 = arith.constant 0.000000e+00 : f32
    %50 = vector.broadcast %cst_22 : f32 to vector<8x128xf32>
    %51 = vector.broadcast %49 : vector<1x1xf32> to vector<8x128xf32>
    %52 = arith.addf %50, %51 : vector<8x128xf32>
    %c0_23 = arith.constant 0 : index
    %c0_24 = arith.constant 0 : index
    %53 = vector.load %arg7[%c0_23, %c0_24] : memref<8x128xf32, #tpu.memory_space<vmem>>, vector<8x128xf32>
    tpu.vector_store %arg7[%c0_23, %c0_24], %52 {strides = array<i32>} : memref<8x128xf32, #tpu.memory_space<vmem>>, vector<8x128xf32>,
    return
  }
}

</mosaic_0001>

<bundles_post_ra>
// kernel: tpu_custom_call.1
= control target key start
LH: loop header
LB: loop body
LE: loop exit
PB: predicated region body
PF: predicated region fallthrough
CT: control target
= control target key end

     0   :  { %13 = vsyncpa [#allocation3], 0  ;;  %vm40_vm0 = vcmask 261120   ;;  %s492_s0 = inlined_call_operand.vmem [shape: f32[16,32], index: 0, kind: input, shape index: {}]   ;;  %s493_s1 = inlined_call_operand.vmem [shape: f32[32,16], index: 1, kind: input, shape index: {}]   ;;  %s494_s2 = inlined_call_operand.vmem [shape: f32[1,16], index: 2, kind: input, shape index: {}]   ;;  %s495_s3 = inlined_call_operand.vmem [shape: f32[8,16], index: 3, kind: input, shape index: {}]   ;;  %s496_s4 = inlined_call_operand.vmem [shape: f32[8,16], index: 4, kind: input, shape index: {}]   ;;  %s497_s5 = inlined_call_operand.vmem [shape: f32[8,16], index: 5, kind: input, shape index: {}]   ;;  %s498_s6 = inlined_call_operand.hbm [shape: f32[16,128], index: 6, kind: output, shape index: {0}]   ;;  %s499_s7 = inlined_call_operand.hbm [shape: f32[8,128], index: 7, kind: output, shape index: {1}]  }
   0x1   :  { %v32_v0 = vld [vmem:[%s493_s1 + $0x18] sm:$0xff]  ;;  %v31_v1 = vld [vmem:[%s493_s1 + $0x10] sm:$0xff]  ;;  %v27_v2 = vld [vmem:[%s492_s0] sm:$0xff] }
   0x2   :  { %319 = vmatprep.subr.mxu0 %v32_v0  ;;  %v30_v3 = vld [vmem:[%s493_s1 + $0x8] sm:$0xff]  ;;  %327 = vmatprep.mubr.msk.f32.mxu0 %vm40_vm0, %v27_v2 }
   0x3   :  { %320 = vmatpush3.msra.mxu0 %v32_v0 }
   0x4   :  { %14 = vsyncpa [#allocation5], 0  ;;  %321 = vmatprep.subr.mxu0 %v31_v1  ;;  %v29_v4 = vld [vmem:[%s493_s1] sm:$0xff]  ;;  %v28_v5 = vld [vmem:[%s492_s0 + $0x8] sm:$0xff]  ;;  %vm124_vm1 = vcmask 130048   ;;  %v401_v15 = vmov 0.0  }
   0x5   :  { %322 = vmatpush3.msra.mxu0 %v31_v1  ;;  %v303_v6 = vld [vmem:[%s494_s2] ss:$0 sm:$0xff]  ;;  %330 = vmatprep.subr.mxu1 %v401_v15  ;;  %vm402_vm2 = vmmov 0  }
   0x6   :  { %323 = vmatprep.subr.mxu0 %v30_v3  ;;  %334 = vmatprep.mubr.msk.f32.mxu1 %vm402_vm2, %v401_v15  ;;  %v141_v25 = vld [vmem:[%s495_s3] sm:$0xff]  ;;  %s403_s3 = smov [#allocation2]  }
   0x7   :  { %324 = vmatpush3.msra.mxu0 %v30_v3  ;;  %v221_v27 = vld [vmem:[%s496_s4] sm:$0xff]  ;;  %s278_s4 = sshll.u32 %s403_s3, 4  ;;  %s279_s4 = int_to_ptr.vmem [resolvable:$true] %s278_s4 }
   0x8   :  { %325 = vmatprep.subr.mxu0 %v29_v4  ;;  %vm223_vm3 = vcmp.ne.f32.partialorder %v221_v27, -100.0  ;;  %v222_v28 = vld [vmem:[%s497_s5] sm:$0xff]  ;;  %s357_s5 = scalar_lea.vmem %s279_s4, 256  ;;  %p362_p1 = scmp.lt.s32.totalorder %s279_s4, %s279_s4 }
   0x9   :  { %326 = vmatpush3.msra.mxu0 %v29_v4  ;;  %v309_v29 = vsel %vm223_vm3, 1.0, %v401_v15  ;;  %p358_p0 = scmp.ne.s32.totalorder %s279_s4, %s357_s5  ;;  %p363_p2 = scmp.lt.s32.totalorder %s357_s5, %s357_s5 }
   0xa   :  { %328 = vmatmul.mubr.msk.f32.vlgmr.msra.gmra.mxu0 %vm40_vm0, %v28_v5  ;;  %v226_v30 = vmul.f32 %v309_v29, %v222_v28 }
   0xb   :  { %p364_p3 = por %p363_p2, %p362_p1 }
   0xc   :  { %v228_v40 = vmul.f32 %v226_v30, %v221_v27  ;;  %v258_v53 = vsel %vm124_vm1, %v226_v30, 0.0 }
   0xd   :  { %p365_p4 = pnand %p364_p3, %p358_p0 }
  0xca   :  { %v329_v7 = vpop.f32.mrf.mxu0 }
  0xcb   :  { %v119_v8 = vadd.f32 %v329_v7, %v303_v6 }
  0xcc   :  { %v113_v9 = vpop.f32.mrf.mxu0 }
  0xcd   :  { %v114_v10 = vadd.f32 %v303_v6, %v113_v9  ;;  %v123_v11 = vmul.f32 %v119_v8, %v119_v8 }
  0xcf   :  { %v128_v12 = vsel %vm124_vm1, %v123_v11, 0.0  ;;  %v122_v13 = vmul.f32 %v114_v10, %v114_v10 }
  0xd0   :  { %129 = vadd.xlane.f32.xlu0 %v128_v12 }
  0xd1   :  { %v125_v14 = vsel %vm124_vm1, %v122_v13, 0.0 }
  0xd4   :  { %126 = vadd.xlane.f32.xlu0 %v125_v14 }
 0x159   :  { %v130_v16 = vpop.xlane.xlu0 %129 }
 0x15a   :  { %v132_v17 = vmax.f32 %v130_v16, 1e-24 }
 0x15c   :  { %347 = vrsqrt.f32 %v132_v17 }
 0x15d   :  { %v127_v18 = vpop.xlane.xlu0 %126 }
 0x15e   :  { %v131_v19 = vmax.f32 %v127_v18, 1e-24 }
 0x160   :  { %349 = vrsqrt.f32 %v131_v19 }
 0x169   :  { %v348_v20 = vpop.eup %347 }
 0x16a   :  { %v136_v21 = vmul.f32 %v348_v20, %v119_v8 }
 0x16c   :  { %331 = vmatpush3.xpose.msk.msra.mxu1 %vm124_vm1, %v136_v21  ;;  %v138_v22 = vsel %vm124_vm1, %v136_v21, 0.0 }
 0x16d   :  { %v350_v23 = vpop.eup %349  ;;  %332 = vmatprep.subr.mxu1 %v401_v15  ;;  %140 = vst [vmem:[#allocation2 + $0x8] sm:$0xff] %v138_v22 }
 0x16e   :  { %v135_v24 = vmul.f32 %v350_v23, %v114_v10 }
 0x170   :  { %333 = vmatpush3.xpose.msk.msra.mxu1 %vm124_vm1, %v135_v24  ;;  %v137_v26 = vsel %vm124_vm1, %v135_v24, 0.0 }
 0x171   :  { %139 = vst [vmem:[#allocation2] sm:$0xff] %v137_v26 }
 0x173   :  { %335 = vmatmul.mubr.msk.f32.vlgmr.msra.gmra.mxu1 %vm124_vm1, %v141_v25 }
 0x233   :  { %v217_v31 = vpop.f32.mrf.mxu1 }
 0x234   :  { %v227_v32 = vmul.f32 %v226_v30, %v217_v31 }
 0x235   :  { %v336_v33 = vpop.f32.mrf.mxu1 }
 0x236   :  { %v232_v34 = vand.u32 2147483647, %v227_v32  ;;  %v229_v42 = vmax.f32 %v227_v32, 0.0  ;;  %v230_v43 = vmul.f32 %v228_v40, %v227_v32 }
 0x238   :  { %v233_v35 = vsub.f32 0.0, %v232_v34  ;;  %v231_v48 = vsub.f32 %v229_v42, %v230_v43 }
 0x23a   :  { %v234_v36 = vmul.f32 1.442695, %v233_v35 }
 0x23c   :  { %351 = vpow2.f32 %v234_v36 }
 0x249   :  { %v352_v37 = vpop.eup %351 }
 0x24a   :  { %v236_v38 = vadd.f32 1.0, %v352_v37  ;;  %v239_v39 = vmul.f32 -0.5, %v352_v37  ;;  %v242_v44 = vand.u32 2147483647, %v352_v37 }
 0x24c   :  { %353 = vlog2.f32 %v236_v38  ;;  %v240_v41 = vadd.f32 1.0, %v239_v39  ;;  %vm243_vm4 = vcmp.lt.f32.partialorder %v242_v44, 0.0004427343 }
 0x24e   :  { %v241_v47 = vmul.f32 %v352_v37, %v240_v41 }
 0x259   :  { %v354_v45 = vpop.eup %353 }
 0x25a   :  { %v238_v46 = vmul.f32 0.6931472, %v354_v45 }
 0x25c   :  { %v244_v49 = vsel %vm243_vm4, %v241_v47, %v238_v46 }
 0x25d   :  { %v245_v50 = vadd.f32 %v244_v49, %v231_v48 }
 0x25f   :  { %v246_v51 = vmul.f32 %v245_v50, %v222_v28 }
 0x261   :  { %v247_v52 = vsel %vm124_vm1, %v246_v51, 0.0 }
 0x262   :  { %248 = vadd.xlane.f32.xlu1 %v247_v52 }
 0x266   :  { %259 = vadd.xlane.f32.xlu1 %v258_v53 }
 0x267   :  { %368 = shalt.err (!%p365_p4)
}
 0x268   :  { %s404_s18 = smov 128   ;;  %s405_s19 = smov 8  }
 0x269   :  { %284 = dma.vmem_to_hbm [thread:$0]  %s279_s4, 256, %s498_s6, [#allocation3], %s404_s18, %s404_s18, %s405_s19  }
 0x26a   :  { %s406_s6 = smov [#allocation4]  }
 0x26b   :  { %s291_s24 = sshll.u32 %s406_s6, 4  ;;  %s292_s24 = int_to_ptr.vmem [resolvable:$true] %s291_s24 }
 0x26c   :  { %s377_s25 = scalar_lea.vmem %s292_s24, 128  ;;  %p382_p6 = scmp.lt.s32.totalorder %s292_s24, %s292_s24 }
 0x26d   :  { %p378_p5 = scmp.ne.s32.totalorder %s292_s24, %s377_s25  ;;  %p383_p7 = scmp.lt.s32.totalorder %s377_s25, %s377_s25 }
 0x26f   :  { %p384_p8 = por %p383_p7, %p382_p6 }
 0x271   :  { %p385_p9 = pnand %p384_p8, %p378_p5 }
 0x2eb   :  { %v249_v54 = vpop.xlane.xlu1 %248 }
 0x2ec   :  { %v250_v55 = vrot.slane %v249_v54, 4 }
 0x2ee   :  { %v251_v56 = vadd.f32 %v250_v55, %v249_v54 }
 0x2ef   :  { %v260_v57 = vpop.xlane.xlu1 %259 }
 0x2f0   :  { %v252_v58 = vrot.slane %v251_v56, 2  ;;  %v261_v59 = vrot.slane %v260_v57, 4 }
 0x2f2   :  { %v262_v60 = vadd.f32 %v261_v59, %v260_v57  ;;  %v253_v61 = vadd.f32 %v252_v58, %v251_v56 }
 0x2f4   :  { %v263_v62 = vrot.slane %v262_v60, 2  ;;  %v254_v63 = vrot.slane %v253_v61, 1 }
 0x2f6   :  { %v264_v0 = vadd.f32 %v263_v62, %v262_v60  ;;  %v255_v1 = vadd.f32 %v254_v63, %v253_v61 }
 0x2f8   :  { %337 = vpush %v255_v1  ;;  %v265_v2 = vrot.slane %v264_v0, 1 }
 0x2fa   :  { %v266_v3 = vadd.f32 %v265_v2, %v264_v0 }
 0x2fc   :  { %339 = vpush %v266_v3 }
 0x329   :  { %s338_s22 = spop %337 }
 0x32a   :  { %v257_v6 = vstv %s338_s22 }
 0x32d   :  { %s340_s23 = spop %339 }
 0x32e   :  { %v268_v4 = vstv %s340_s23 }
 0x32f   :  { %355 = vrcp.f32 %v268_v4 }
 0x33c   :  { %v356_v5 = vpop.eup %355 }
 0x33d   :  { %v270_v7 = vmul.f32 %v356_v5, %v257_v6 }
 0x33f   :  { %272 = vst [vmem:[#allocation4] sm:$0xff] %v270_v7 }
 0x340   :  { %388 = shalt.err (!%p385_p9)
}
 0x341   :  { %294 = dma.vmem_to_hbm [thread:$0]  %s292_s24, 128, %s499_s7, [#allocation5]  }
 0x342   :  { %397 = dma.done.wait [#allocation3], 256  }
 0x343   :  { %398 = vsyncadd [#allocation3], 4294967040 }
 0x344   :  { %399 = dma.done.wait [#allocation5], 128  }
 0x345   :  { %400 = vsyncadd [#allocation5], 4294967168 }
 0x346   :  { %301 = vsyncpa [#allocation3], 1 }
 0x347   :  { %302 = vsyncpa [#allocation5], 1 }

</bundles_post_ra>
